<compile_context>
chip_gen: v5e
topology: v5e:2x2
jax: 0.10.0
libtpu: 0.0.40
codegen_flags: <defaults>
</compile_context>

<pallas_src>
import functools

import jax
import jax.numpy as jnp
from jax.experimental import pallas as pl
from jax.experimental.pallas import tpu as pltpu

# Below this size a single DMA descriptor is strictly better; above it,
# multiple in-flight DMAs raise effective HBM bandwidth (mainly on v7x).
_CHUNKED_COPY_MIN_BYTES = 8 * 1024 * 1024
_MAX_COPY_CHUNKS = 8


def _hbm_copy_kernel(w_hbm, o_hbm, sem):
    # Single whole-tensor HBM -> HBM DMA; no VMEM staging, no vector slots.
    cp = pltpu.make_async_copy(w_hbm, o_hbm, sem)
    cp.start()
    cp.wait()


def _hbm_chunked_copy_kernel(w_hbm, o_hbm, sem, *, n_chunks, chunk):
    # n_chunks independent HBM -> HBM DMAs over the leading dim.
    # Start them all (multiple in-flight transactions), then wait on all.
    copies = []
    for c in range(n_chunks):
        sl = pl.ds(c * chunk, chunk)
        cp = pltpu.make_async_copy(w_hbm.at[sl], o_hbm.at[sl], sem.at[c])
        cp.start()
        copies.append(cp)
    for cp in copies:
        cp.wait()


def synthesized_image_forward(weight: jax.Array, *, materialize: bool = False) -> jax.Array:
    """Forward pass of SynthesizedImage.

    materialize=False (default): return the parameter itself (aliased) — the
        exact identity forward of the PyTorch module; no kernel, no HBM traffic.
    materialize=True : return a fresh buffer filled by HBM -> HBM DMA(s).
    """
    if not materialize:
        return weight

    nbytes = weight.size * weight.dtype.itemsize
    cost = pl.CostEstimate(flops=0, transcendentals=0, bytes_accessed=2 * nbytes)

    lead = weight.shape[0] if weight.ndim > 0 else 1
    use_chunks = nbytes >= _CHUNKED_COPY_MIN_BYTES and weight.ndim > 0 and lead > 1

    if use_chunks:
        # Pick the largest chunk count (<= _MAX_COPY_CHUNKS) that divides the
        # leading dim evenly; fall back to single DMA if none.
        n_chunks = 1
        for cand in range(min(_MAX_COPY_CHUNKS, lead), 1, -1):
            if lead % cand == 0:
                n_chunks = cand
                break
        if n_chunks > 1:
            kernel = functools.partial(
                _hbm_chunked_copy_kernel, n_chunks=n_chunks, chunk=lead // n_chunks
            )
            return pl.pallas_call(
                kernel,
                out_shape=jax.ShapeDtypeStruct(weight.shape, weight.dtype),
                in_specs=[pl.BlockSpec(memory_space=pl.ANY)],
                out_specs=pl.BlockSpec(memory_space=pl.ANY),
                scratch_shapes=[pltpu.SemaphoreType.DMA((n_chunks,))],
                cost_estimate=cost,
            )(weight)

    return pl.pallas_call(
        _hbm_copy_kernel,
        out_shape=jax.ShapeDtypeStruct(weight.shape, weight.dtype),
        in_specs=[pl.BlockSpec(memory_space=pl.ANY)],
        out_specs=pl.BlockSpec(memory_space=pl.ANY),
        scratch_shapes=[pltpu.SemaphoreType.DMA(())],
        cost_estimate=cost,
    )(weight)


class SynthesizedImage:
    """JAX/Pallas port of the PyTorch SynthesizedImage module."""

    def __init__(self, img_shape, key):
        # torch.rand(*img_shape) -> U[0, 1)
        self.weight = jax.random.uniform(key, img_shape, dtype=jnp.float32)

    def __call__(self, materialize: bool = False):
        return synthesized_image_forward(self.weight, materialize=materialize)


if __name__ == "__main__":
    key = jax.random.PRNGKey(0)
    img_shape = (2, 4, 16, 16)  # (N, C, H, W), small synthetic shape

    model = SynthesizedImage(img_shape, key)

    # Default fast path: aliased identity return (matches PyTorch forward()).
    out_alias = model()
    out_alias = jax.block_until_ready(out_alias)
    assert out_alias.shape == img_shape
    assert out_alias.dtype == jnp.float32
    assert bool(jnp.array_equal(out_alias, model.weight))

    # Materializing (kernel) path: fresh buffer via one HBM->HBM DMA.
    out = model(materialize=True)
    out = jax.block_until_ready(out)
    assert out.shape == img_shape
    assert out.dtype == jnp.float32
    assert bool(jnp.array_equal(out, model.weight))

    print("KERNEL_OK")
</pallas_src>

<mosaic_0001>
module attributes {stable_mosaic.version = 11 : i64} {
  func.func @_hbm_copy_kernel(%arg0: memref<2x4x16x16xf32, #tpu.memory_space<any>>, %arg1: memref<2x4x16x16xf32, #tpu.memory_space<any>>, %arg2: memref<!tpu.dma_semaphore, #tpu.memory_space<semaphore_mem>>) attributes {dimension_semantics = [], scalar_prefetch = 0 : i64, scratch_operands = 1 : i64, tpu.core_type = #tpu.core_type<tc>} {
    tpu.enqueue_dma source(%arg0 : memref<2x4x16x16xf32, #tpu.memory_space<any>>) target(%arg1 : memref<2x4x16x16xf32, #tpu.memory_space<any>>) target_semaphore(%arg2 : memref<!tpu.dma_semaphore, #tpu.memory_space<semaphore_mem>>)
    tpu.wait_dma2 semaphore(%arg2 : memref<!tpu.dma_semaphore, #tpu.memory_space<semaphore_mem>>) src(%arg0 : memref<2x4x16x16xf32, #tpu.memory_space<any>>) dst(%arg1 : memref<2x4x16x16xf32, #tpu.memory_space<any>>)
    return
  }
}

</mosaic_0001>

<bundles_post_ra>
// kernel: tpu_custom_call.1
= control target key start
LH: loop header
LB: loop body
LE: loop exit
PB: predicated region body
PF: predicated region fallthrough
CT: control target
= control target key end

     0   :  { %s34_s12 = smov [#allocation2]   ;;  %s35_s13 = smov [#allocation3]   ;;  %s53_s0 = inlined_call_operand.hbm [shape: f32[2,4,16,16], index: 0, kind: input, shape index: {}]   ;;  %s54_s1 = inlined_call_operand.hbm [shape: f32[2,4,16,16], index: 1, kind: output, shape index: {}]  }
   0x1   :  { %s10_s8 = sshll.u32 %s53_s0, 4  ;;  %s12_s11 = sshll.u32 %s54_s1, 4  ;;  %s11_s8 = int_to_ptr.hbm [resolvable:$true] %s10_s8  ;;  %s13_s11 = int_to_ptr.hbm [resolvable:$true] %s12_s11 }
   0x2   :  { %s36_s14 = smov 0  }
   0x3   :  { %16 = dma.general %s11_s8, 2048, %s13_s11, %s34_s12, %s35_s13, [#allocation4], %s36_s14, 0  }
   0x4   :  { %32 = dma.done.wait [#allocation2], 2048 }
   0x5   :  { %33 = vsyncadd [#allocation2], 4294965248 }
   0x6   :  { %22 = vsyncmov [#allocation2] }
   0x9   :  { %s23_s15 = vpop.sfrf %22 }
   0xa   :  { %p28_p0 = scmp.ne.s32.totalorder %s23_s15, 0 }
   0xc   :  { %27 = shalt.err (%p28_p0)  }

</bundles_post_ra>
